<compile_context>
chip_gen: v6e
topology: v6e:2x2x1
jax: 0.10.0
libtpu: 0.0.40
codegen_flags: <defaults>
</compile_context>

<pallas_src>
import functools

import jax
import jax.numpy as jnp
from jax.experimental import pallas as pl
from jax.experimental.pallas import tpu as pltpu

_SUBLANES = 8
_PAD = 128  # lane-aligned zero guard band on each side of the per-image flat spatial axis


def _round_up(x, m):
    return (x + m - 1) // m * m


def _den_conv_kernel(x_ref, w_ref, b_ref, o_ref, pad_ref, *, K, H, W, cin):
    """One image per grid step.

    x_ref  : (1, cin, H*W)              raw input channels (un-padded)
    w_ref  : (K*K, Cout, cin_p)         per-tap weights, tap order (ky, kx)
    b_ref  : (Cout, 1)                  bias
    o_ref  : (1, Cout, H*W)             output, flattened NCHW
    pad_ref: (cin_p, _PAD + H*W + _PAD) VMEM scratch for spatial zero padding
    """
    HW = H * W
    cin_p = pad_ref.shape[0]
    cout = w_ref.shape[1]
    half = (K - 1) // 2

    # ---- zero only the guard bands + the padded channel sublanes; the live
    # middle lanes are fully overwritten by the input copy right below.
    pad_ref[:, :_PAD] = jnp.zeros((cin_p, _PAD), jnp.float32)
    pad_ref[:, _PAD + HW:] = jnp.zeros((cin_p, _PAD), jnp.float32)
    if cin < cin_p:
        pad_ref[cin:, _PAD:_PAD + HW] = jnp.zeros((cin_p - cin, HW), jnp.float32)
    pad_ref[:cin, _PAD:_PAD + HW] = x_ref[0]

    # ---- horizontal wrap masks (vertical out-of-image taps read guard-band
    # zeros, so no row mask is needed).  dx == 0 taps need no mask at all.
    ww = jax.lax.broadcasted_iota(jnp.int32, (1, HW), 1) % W
    col_valid = {dx: (ww + dx >= 0) & (ww + dx < W)
                 for dx in range(-half, half + 1) if dx != 0}

    # ---- K*K accumulating MXU matmuls; no im2col patch matrix is materialized.
    acc = jnp.zeros((cout, HW), jnp.float32)
    for ky in range(K):
        for kx in range(K):
            dy, dx = ky - half, kx - half
            d = dy * W + dx
            slab = pad_ref[:, _PAD + d:_PAD + d + HW]          # (cin_p, HW)
            if dx != 0:
                slab = jnp.where(col_valid[dx], slab, 0.0)
            acc += jnp.dot(w_ref[ky * K + kx], slab,
                           preferred_element_type=jnp.float32)

    # ---- bias + ReLU, lane-dense store straight into flattened NCHW.
    o_ref[0] = jnp.maximum(acc + b_ref[...], 0.0).astype(o_ref.dtype)


def pack_den_conv_params(weight_oihw, bias):
    """One-time Conv2d parameter repack (hoisted out of the per-call path).

    Returns (w_packed, b_col):
      w_packed: (K*K, Cout, Cin_p) with Cin zero-padded to a sublane multiple,
                tap rows ordered (ky, kx).
      b_col   : (Cout, 1)
    """
    cout, cin, K, _ = weight_oihw.shape
    cin_p = _round_up(cin, _SUBLANES)
    w = jnp.transpose(weight_oihw, (2, 3, 0, 1))                 # (K, K, Cout, Cin)
    w = jnp.pad(w, ((0, 0), (0, 0), (0, 0), (0, cin_p - cin)))   # Cin -> Cin_p (zeros)
    w = w.reshape(K * K, cout, cin_p).astype(jnp.float32)
    b = bias.reshape(cout, 1).astype(jnp.float32)
    return w, b


def den_conv_block(x_nchw, w_packed, b_col):
    """DENConvBlock forward: ReLU(Conv2d(x, W, b, kernel=KxK, stride=1, padding=K//2))."""
    N, cin, H, W = x_nchw.shape
    KK, cout, cin_p = w_packed.shape
    K = int(round(KK ** 0.5))
    HW = H * W
    assert (K // 2) * (W + 1) <= _PAD, "guard band too small for this W/K"

    # Free reshape only; no wrapper-side activation padding.
    x_flat = x_nchw.reshape(N, cin, HW)

    kernel = functools.partial(_den_conv_kernel, K=K, H=H, W=W, cin=cin)
    out_flat = pl.pallas_call(
        kernel,
        out_shape=jax.ShapeDtypeStruct((N, cout, HW), jnp.float32),
        grid=(N,),
        in_specs=[
            pl.BlockSpec((1, cin, HW), lambda n: (n, 0, 0)),
            pl.BlockSpec((KK, cout, cin_p), lambda n: (0, 0, 0)),
            pl.BlockSpec((cout, 1), lambda n: (0, 0)),
        ],
        out_specs=pl.BlockSpec((1, cout, HW), lambda n: (n, 0, 0)),
        scratch_shapes=[pltpu.VMEM((cin_p, _PAD + HW + _PAD), jnp.float32)],
        compiler_params=pltpu.CompilerParams(
            dimension_semantics=("parallel",)),
    )(x_flat, w_packed, b_col)

    return out_flat.reshape(N, cout, H, W)


if __name__ == "__main__":
    key = jax.random.PRNGKey(0)
    k_w, k_b, k_x = jax.random.split(key, 3)

    N, in_channels, out_channels, H, W = 2, 4, 8, 16, 16
    K = 3

    # PyTorch Conv2d default init: U(-1/sqrt(fan_in), 1/sqrt(fan_in)).
    fan_in = in_channels * K * K
    bound = 1.0 / (fan_in ** 0.5)
    weight = jax.random.uniform(k_w, (out_channels, in_channels, K, K),
                                jnp.float32, -bound, bound)
    bias = jax.random.uniform(k_b, (out_channels,), jnp.float32, -bound, bound)
    x = jax.random.normal(k_x, (N, in_channels, H, W), jnp.float32)

    # One-time parameter repack, hoisted out of the jitted per-call path.
    w_packed, b_col = pack_den_conv_params(weight, bias)

    fwd = jax.jit(den_conv_block)
    out = jax.block_until_ready(fwd(x, w_packed, b_col))

    assert out.shape == (N, out_channels, H, W), out.shape
    assert bool(jnp.all(jnp.isfinite(out)))

    # Cross-check against XLA's f32 convolution reference.
    ref = jax.lax.conv_general_dilated(
        x, weight, window_strides=(1, 1),
        padding=((K // 2, K // 2), (K // 2, K // 2)),
        dimension_numbers=("NCHW", "OIHW", "NCHW"),
        precision=jax.lax.Precision.HIGHEST)
    ref = jnp.maximum(ref + bias.reshape(1, -1, 1, 1), 0.0)
    err = float(jnp.max(jnp.abs(out - ref)))
    assert jnp.allclose(out, ref, rtol=1e-3, atol=1e-3), err

    print("KERNEL_OK")
</pallas_src>

<mosaic_0001>
module attributes {stable_mosaic.version = 11 : i64} {
  func.func @_den_conv_kernel(%arg0: i32, %arg1: memref<1x4x256xf32, #tpu.memory_space<vmem>>, %arg2: memref<9x8x8xf32, #tpu.memory_space<vmem>>, %arg3: memref<8x1xf32, #tpu.memory_space<vmem>>, %arg4: memref<1x8x256xf32, #tpu.memory_space<vmem>>, %arg5: memref<8x512xf32, #tpu.memory_space<vmem>>) attributes {dimension_semantics = [#tpu.dimension_semantics<parallel>], iteration_bounds = array<i64: 2>, scalar_prefetch = 0 : i64, scratch_operands = 1 : i64, tpu.core_type = #tpu.core_type<tc>, window_params = [{transform_indices = @transform_0, window_bounds = array<i64: 1, 4, 256>}, {pipeline_mode = #tpu.pipeline_mode<synchronous>, transform_indices = @transform_1, window_bounds = array<i64: 9, 8, 8>}, {pipeline_mode = #tpu.pipeline_mode<synchronous>, transform_indices = @transform_2, window_bounds = array<i64: 8, 1>}, {transform_indices = @transform_3, window_bounds = array<i64: 1, 8, 256>}]} {
    %cst = arith.constant 0.000000e+00 : f32
    %0 = vector.broadcast %cst : f32 to vector<8x128xf32>
    %c0 = arith.constant 0 : index
    %c0_0 = arith.constant 0 : index
    %1 = vector.load %arg5[%c0, %c0_0] : memref<8x512xf32, #tpu.memory_space<vmem>>, vector<8x128xf32>
    tpu.vector_store %arg5[%c0, %c0_0], %0 {strides = array<i32>} : memref<8x512xf32, #tpu.memory_space<vmem>>, vector<8x128xf32>,
    %cst_1 = arith.constant 0.000000e+00 : f32
    %2 = vector.broadcast %cst_1 : f32 to vector<8x128xf32>
    %c0_2 = arith.constant 0 : index
    %c384 = arith.constant 384 : index
    %3 = vector.load %arg5[%c0_2, %c384] : memref<8x512xf32, #tpu.memory_space<vmem>>, vector<8x128xf32>
    tpu.vector_store %arg5[%c0_2, %c384], %2 {strides = array<i32>} : memref<8x512xf32, #tpu.memory_space<vmem>>, vector<8x128xf32>,
    %cst_3 = arith.constant 0.000000e+00 : f32
    %4 = vector.broadcast %cst_3 : f32 to vector<4x256xf32>
    %c4 = arith.constant 4 : index
    %c128 = arith.constant 128 : index
    %5 = vector.load %arg5[%c4, %c128] : memref<8x512xf32, #tpu.memory_space<vmem>>, vector<4x256xf32>
    tpu.vector_store %arg5[%c4, %c128], %4 {strides = array<i32>} : memref<8x512xf32, #tpu.memory_space<vmem>>, vector<4x256xf32>,
    %c0_4 = arith.constant 0 : index
    %c0_5 = arith.constant 0 : index
    %c0_6 = arith.constant 0 : index
    %6 = vector.load %arg1[%c0_4, %c0_5, %c0_6] : memref<1x4x256xf32, #tpu.memory_space<vmem>>, vector<1x4x256xf32>
    %7 = vector.shape_cast %6 : vector<1x4x256xf32> to vector<4x256xf32>
    %c0_7 = arith.constant 0 : index
    %c128_8 = arith.constant 128 : index
    %8 = vector.load %arg5[%c0_7, %c128_8] : memref<8x512xf32, #tpu.memory_space<vmem>>, vector<4x256xf32>
    tpu.vector_store %arg5[%c0_7, %c128_8], %7 {strides = array<i32>} : memref<8x512xf32, #tpu.memory_space<vmem>>, vector<4x256xf32>,
    %9 = tpu.iota {dimensions = array<i32: 1>} : vector<1x256xi32>
    %c16_i32 = arith.constant 16 : i32
    %c0_i32 = arith.constant 0 : i32
    %10 = arith.cmpi eq, %c16_i32, %c0_i32 : i32
    %c1_i32 = arith.constant 1 : i32
    %11 = arith.select %10, %c1_i32, %c16_i32 : i32
    %12 = vector.broadcast %11 : i32 to vector<1x256xi32>
    %13 = arith.remsi %9, %12 : vector<1x256xi32>
    %c0_i32_9 = arith.constant 0 : i32
    %14 = vector.broadcast %c0_i32_9 : i32 to vector<1x256xi32>
    %15 = arith.cmpi ne, %13, %14 : vector<1x256xi32>
    %c0_i32_10 = arith.constant 0 : i32
    %16 = vector.broadcast %c0_i32_10 : i32 to vector<1x256xi32>
    %17 = arith.cmpi slt, %13, %16 : vector<1x256xi32>
    %c0_i32_11 = arith.constant 0 : i32
    %18 = arith.cmpi slt, %11, %c0_i32_11 : i32
    %19 = vector.broadcast %18 : i1 to vector<1x256xi1>
    %20 = vector.broadcast %19 : vector<1x256xi1> to vector<1x256xi1>
    %21 = arith.xori %17, %20 : vector<1x256xi1>
    %22 = arith.andi %21, %15 : vector<1x256xi1>
    %23 = vector.broadcast %11 : i32 to vector<1x256xi32>
    %24 = arith.addi %13, %23 : vector<1x256xi32>
    %25 = arith.select %22, %24, %13 : vector<1x256xi1>, vector<1x256xi32>
    %c-1_i32 = arith.constant -1 : i32
    %26 = vector.broadcast %c-1_i32 : i32 to vector<1x256xi32>
    %27 = arith.addi %25, %26 : vector<1x256xi32>
    %c0_i32_12 = arith.constant 0 : i32
    %28 = vector.broadcast %c0_i32_12 : i32 to vector<1x256xi32>
    %29 = arith.cmpi sge, %27, %28 : vector<1x256xi32>
    %c-1_i32_13 = arith.constant -1 : i32
    %30 = vector.broadcast %c-1_i32_13 : i32 to vector<1x256xi32>
    %31 = arith.addi %25, %30 : vector<1x256xi32>
    %c16_i32_14 = arith.constant 16 : i32
    %32 = vector.broadcast %c16_i32_14 : i32 to vector<1x256xi32>
    %33 = arith.cmpi slt, %31, %32 : vector<1x256xi32>
    %34 = arith.andi %29, %33 : vector<1x256xi1>
    %c1_i32_15 = arith.constant 1 : i32
    %35 = vector.broadcast %c1_i32_15 : i32 to vector<1x256xi32>
    %36 = arith.addi %25, %35 : vector<1x256xi32>
    %c0_i32_16 = arith.constant 0 : i32
    %37 = vector.broadcast %c0_i32_16 : i32 to vector<1x256xi32>
    %38 = arith.cmpi sge, %36, %37 : vector<1x256xi32>
    %c1_i32_17 = arith.constant 1 : i32
    %39 = vector.broadcast %c1_i32_17 : i32 to vector<1x256xi32>
    %40 = arith.addi %25, %39 : vector<1x256xi32>
    %c16_i32_18 = arith.constant 16 : i32
    %41 = vector.broadcast %c16_i32_18 : i32 to vector<1x256xi32>
    %42 = arith.cmpi slt, %40, %41 : vector<1x256xi32>
    %43 = arith.andi %38, %42 : vector<1x256xi1>
    %cst_19 = arith.constant 0.000000e+00 : f32
    %44 = vector.broadcast %cst_19 : f32 to vector<8x256xf32>
    %c0_20 = arith.constant 0 : index
    %c111 = arith.constant 111 : index
    %45 = vector.load %arg5[%c0_20, %c111] : memref<8x512xf32, #tpu.memory_space<vmem>>, vector<8x256xf32>
    %cst_21 = arith.constant 0.000000e+00 : f32
    %46 = vector.shape_cast %34 : vector<1x256xi1> to vector<1x256xi1>
    %47 = vector.broadcast %46 : vector<1x256xi1> to vector<8x256xi1>
    %48 = vector.broadcast %cst_21 : f32 to vector<8x256xf32>
    %49 = arith.select %47, %45, %48 : vector<8x256xi1>, vector<8x256xf32>
    %c0_22 = arith.constant 0 : index
    %c0_23 = arith.constant 0 : index
    %c0_24 = arith.constant 0 : index
    %50 = vector.load %arg2[%c0_22, %c0_23, %c0_24] : memref<9x8x8xf32, #tpu.memory_space<vmem>>, vector<1x8x8xf32>
    %51 = vector.shape_cast %50 : vector<1x8x8xf32> to vector<8x8xf32>
    %cst_25 = arith.constant dense<0.000000e+00> : vector<8x256xf32>
    %52 = tpu.matmul %51, %49, %cst_25 {dimension_numbers = #tpu.dot_dimension_numbers<[1], [0], [0], [1], [0, 0, 1, 1], [], []>} : vector<8x8xf32>, vector<8x256xf32>, vector<8x256xf32> -> vector<8x256xf32>
    %53 = arith.addf %44, %52 : vector<8x256xf32>
    %c0_26 = arith.constant 0 : index
    %c112 = arith.constant 112 : index
    %54 = vector.load %arg5[%c0_26, %c112] : memref<8x512xf32, #tpu.memory_space<vmem>>, vector<8x256xf32>
    %c1 = arith.constant 1 : index
    %c0_27 = arith.constant 0 : index
    %c0_28 = arith.constant 0 : index
    %55 = vector.load %arg2[%c1, %c0_27, %c0_28] : memref<9x8x8xf32, #tpu.memory_space<vmem>>, vector<1x8x8xf32>
    %56 = vector.shape_cast %55 : vector<1x8x8xf32> to vector<8x8xf32>
    %cst_29 = arith.constant dense<0.000000e+00> : vector<8x256xf32>
    %57 = tpu.matmul %56, %54, %cst_29 {dimension_numbers = #tpu.dot_dimension_numbers<[1], [0], [0], [1], [0, 0, 1, 1], [], []>} : vector<8x8xf32>, vector<8x256xf32>, vector<8x256xf32> -> vector<8x256xf32>
    %58 = arith.addf %53, %57 : vector<8x256xf32>
    %c0_30 = arith.constant 0 : index
    %c113 = arith.constant 113 : index
    %59 = vector.load %arg5[%c0_30, %c113] : memref<8x512xf32, #tpu.memory_space<vmem>>, vector<8x256xf32>
    %cst_31 = arith.constant 0.000000e+00 : f32
    %60 = vector.shape_cast %43 : vector<1x256xi1> to vector<1x256xi1>
    %61 = vector.broadcast %60 : vector<1x256xi1> to vector<8x256xi1>
    %62 = vector.broadcast %cst_31 : f32 to vector<8x256xf32>
    %63 = arith.select %61, %59, %62 : vector<8x256xi1>, vector<8x256xf32>
    %c2 = arith.constant 2 : index
    %c0_32 = arith.constant 0 : index
    %c0_33 = arith.constant 0 : index
    %64 = vector.load %arg2[%c2, %c0_32, %c0_33] : memref<9x8x8xf32, #tpu.memory_space<vmem>>, vector<1x8x8xf32>
    %65 = vector.shape_cast %64 : vector<1x8x8xf32> to vector<8x8xf32>
    %cst_34 = arith.constant dense<0.000000e+00> : vector<8x256xf32>
    %66 = tpu.matmul %65, %63, %cst_34 {dimension_numbers = #tpu.dot_dimension_numbers<[1], [0], [0], [1], [0, 0, 1, 1], [], []>} : vector<8x8xf32>, vector<8x256xf32>, vector<8x256xf32> -> vector<8x256xf32>
    %67 = arith.addf %58, %66 : vector<8x256xf32>
    %c0_35 = arith.constant 0 : index
    %c127 = arith.constant 127 : index
    %68 = vector.load %arg5[%c0_35, %c127] : memref<8x512xf32, #tpu.memory_space<vmem>>, vector<8x256xf32>
    %cst_36 = arith.constant 0.000000e+00 : f32
    %69 = vector.shape_cast %34 : vector<1x256xi1> to vector<1x256xi1>
    %70 = vector.broadcast %69 : vector<1x256xi1> to vector<8x256xi1>
    %71 = vector.broadcast %cst_36 : f32 to vector<8x256xf32>
    %72 = arith.select %70, %68, %71 : vector<8x256xi1>, vector<8x256xf32>
    %c3 = arith.constant 3 : index
    %c0_37 = arith.constant 0 : index
    %c0_38 = arith.constant 0 : index
    %73 = vector.load %arg2[%c3, %c0_37, %c0_38] : memref<9x8x8xf32, #tpu.memory_space<vmem>>, vector<1x8x8xf32>
    %74 = vector.shape_cast %73 : vector<1x8x8xf32> to vector<8x8xf32>
    %cst_39 = arith.constant dense<0.000000e+00> : vector<8x256xf32>
    %75 = tpu.matmul %74, %72, %cst_39 {dimension_numbers = #tpu.dot_dimension_numbers<[1], [0], [0], [1], [0, 0, 1, 1], [], []>} : vector<8x8xf32>, vector<8x256xf32>, vector<8x256xf32> -> vector<8x256xf32>
    %76 = arith.addf %67, %75 : vector<8x256xf32>
    %c0_40 = arith.constant 0 : index
    %c128_41 = arith.constant 128 : index
    %77 = vector.load %arg5[%c0_40, %c128_41] : memref<8x512xf32, #tpu.memory_space<vmem>>, vector<8x256xf32>
    %c4_42 = arith.constant 4 : index
    %c0_43 = arith.constant 0 : index
    %c0_44 = arith.constant 0 : index
    %78 = vector.load %arg2[%c4_42, %c0_43, %c0_44] : memref<9x8x8xf32, #tpu.memory_space<vmem>>, vector<1x8x8xf32>
    %79 = vector.shape_cast %78 : vector<1x8x8xf32> to vector<8x8xf32>
    %cst_45 = arith.constant dense<0.000000e+00> : vector<8x256xf32>
    %80 = tpu.matmul %79, %77, %cst_45 {dimension_numbers = #tpu.dot_dimension_numbers<[1], [0], [0], [1], [0, 0, 1, 1], [], []>} : vector<8x8xf32>, vector<8x256xf32>, vector<8x256xf32> -> vector<8x256xf32>
    %81 = arith.addf %76, %80 : vector<8x256xf32>
    %c0_46 = arith.constant 0 : index
    %c129 = arith.constant 129 : index
    %82 = vector.load %arg5[%c0_46, %c129] : memref<8x512xf32, #tpu.memory_space<vmem>>, vector<8x256xf32>
    %cst_47 = arith.constant 0.000000e+00 : f32
    %83 = vector.shape_cast %43 : vector<1x256xi1> to vector<1x256xi1>
    %84 = vector.broadcast %83 : vector<1x256xi1> to vector<8x256xi1>
    %85 = vector.broadcast %cst_47 : f32 to vector<8x256xf32>
    %86 = arith.select %84, %82, %85 : vector<8x256xi1>, vector<8x256xf32>
    %c5 = arith.constant 5 : index
    %c0_48 = arith.constant 0 : index
    %c0_49 = arith.constant 0 : index
    %87 = vector.load %arg2[%c5, %c0_48, %c0_49] : memref<9x8x8xf32, #tpu.memory_space<vmem>>, vector<1x8x8xf32>
    %88 = vector.shape_cast %87 : vector<1x8x8xf32> to vector<8x8xf32>
    %cst_50 = arith.constant dense<0.000000e+00> : vector<8x256xf32>
    %89 = tpu.matmul %88, %86, %cst_50 {dimension_numbers = #tpu.dot_dimension_numbers<[1], [0], [0], [1], [0, 0, 1, 1], [], []>} : vector<8x8xf32>, vector<8x256xf32>, vector<8x256xf32> -> vector<8x256xf32>
    %90 = arith.addf %81, %89 : vector<8x256xf32>
    %c0_51 = arith.constant 0 : index
    %c143 = arith.constant 143 : index
    %91 = vector.load %arg5[%c0_51, %c143] : memref<8x512xf32, #tpu.memory_space<vmem>>, vector<8x256xf32>
    %cst_52 = arith.constant 0.000000e+00 : f32
    %92 = vector.shape_cast %34 : vector<1x256xi1> to vector<1x256xi1>
    %93 = vector.broadcast %92 : vector<1x256xi1> to vector<8x256xi1>
    %94 = vector.broadcast %cst_52 : f32 to vector<8x256xf32>
    %95 = arith.select %93, %91, %94 : vector<8x256xi1>, vector<8x256xf32>
    %c6 = arith.constant 6 : index
    %c0_53 = arith.constant 0 : index
    %c0_54 = arith.constant 0 : index
    %96 = vector.load %arg2[%c6, %c0_53, %c0_54] : memref<9x8x8xf32, #tpu.memory_space<vmem>>, vector<1x8x8xf32>
    %97 = vector.shape_cast %96 : vector<1x8x8xf32> to vector<8x8xf32>
    %cst_55 = arith.constant dense<0.000000e+00> : vector<8x256xf32>
    %98 = tpu.matmul %97, %95, %cst_55 {dimension_numbers = #tpu.dot_dimension_numbers<[1], [0], [0], [1], [0, 0, 1, 1], [], []>} : vector<8x8xf32>, vector<8x256xf32>, vector<8x256xf32> -> vector<8x256xf32>
    %99 = arith.addf %90, %98 : vector<8x256xf32>
    %c0_56 = arith.constant 0 : index
    %c144 = arith.constant 144 : index
    %100 = vector.load %arg5[%c0_56, %c144] : memref<8x512xf32, #tpu.memory_space<vmem>>, vector<8x256xf32>
    %c7 = arith.constant 7 : index
    %c0_57 = arith.constant 0 : index
    %c0_58 = arith.constant 0 : index
    %101 = vector.load %arg2[%c7, %c0_57, %c0_58] : memref<9x8x8xf32, #tpu.memory_space<vmem>>, vector<1x8x8xf32>
    %102 = vector.shape_cast %101 : vector<1x8x8xf32> to vector<8x8xf32>
    %cst_59 = arith.constant dense<0.000000e+00> : vector<8x256xf32>
    %103 = tpu.matmul %102, %100, %cst_59 {dimension_numbers = #tpu.dot_dimension_numbers<[1], [0], [0], [1], [0, 0, 1, 1], [], []>} : vector<8x8xf32>, vector<8x256xf32>, vector<8x256xf32> -> vector<8x256xf32>
    %104 = arith.addf %99, %103 : vector<8x256xf32>
    %c0_60 = arith.constant 0 : index
    %c145 = arith.constant 145 : index
    %105 = vector.load %arg5[%c0_60, %c145] : memref<8x512xf32, #tpu.memory_space<vmem>>, vector<8x256xf32>
    %cst_61 = arith.constant 0.000000e+00 : f32
    %106 = vector.shape_cast %43 : vector<1x256xi1> to vector<1x256xi1>
    %107 = vector.broadcast %106 : vector<1x256xi1> to vector<8x256xi1>
    %108 = vector.broadcast %cst_61 : f32 to vector<8x256xf32>
    %109 = arith.select %107, %105, %108 : vector<8x256xi1>, vector<8x256xf32>
    %c8 = arith.constant 8 : index
    %c0_62 = arith.constant 0 : index
    %c0_63 = arith.constant 0 : index
    %110 = vector.load %arg2[%c8, %c0_62, %c0_63] : memref<9x8x8xf32, #tpu.memory_space<vmem>>, vector<1x8x8xf32>
    %111 = vector.shape_cast %110 : vector<1x8x8xf32> to vector<8x8xf32>
    %cst_64 = arith.constant dense<0.000000e+00> : vector<8x256xf32>
    %112 = tpu.matmul %111, %109, %cst_64 {dimension_numbers = #tpu.dot_dimension_numbers<[1], [0], [0], [1], [0, 0, 1, 1], [], []>} : vector<8x8xf32>, vector<8x256xf32>, vector<8x256xf32> -> vector<8x256xf32>
    %113 = arith.addf %104, %112 : vector<8x256xf32>
    %c0_65 = arith.constant 0 : index
    %c0_66 = arith.constant 0 : index
    %114 = vector.load %arg3[%c0_65, %c0_66] : memref<8x1xf32, #tpu.memory_space<vmem>>, vector<8x1xf32>
    %115 = vector.broadcast %114 : vector<8x1xf32> to vector<8x256xf32>
    %116 = arith.addf %113, %115 : vector<8x256xf32>
    %cst_67 = arith.constant 0.000000e+00 : f32
    %117 = vector.broadcast %cst_67 : f32 to vector<8x256xf32>
    %118 = arith.maximumf %116, %117 : vector<8x256xf32>
    %c0_68 = arith.constant 0 : index
    %c0_69 = arith.constant 0 : index
    %c0_70 = arith.constant 0 : index
    %119 = vector.load %arg4[%c0_68, %c0_69, %c0_70] : memref<1x8x256xf32, #tpu.memory_space<vmem>>, vector<1x8x256xf32>
    %120 = vector.shape_cast %119 : vector<1x8x256xf32> to vector<8x256xf32>
    %121 = vector.shape_cast %118 : vector<8x256xf32> to vector<1x8x256xf32>
    tpu.vector_store %arg4[%c0_68, %c0_69, %c0_70], %121 {strides = array<i32>} : memref<1x8x256xf32, #tpu.memory_space<vmem>>, vector<1x8x256xf32>,
    return
  }
  func.func @transform_0(%arg0: i32) -> (i32, i32, i32) {
    %c0_i32 = arith.constant 0 : i32
    %c0_i32_0 = arith.constant 0 : i32
    %c0_i32_1 = arith.constant 0 : i32
    return %arg0, %c0_i32, %c0_i32_0 : i32, i32, i32
  }
  func.func @transform_1(%arg0: i32) -> (i32, i32, i32) {
    %c0_i32 = arith.constant 0 : i32
    %c0_i32_0 = arith.constant 0 : i32
    %c0_i32_1 = arith.constant 0 : i32
    %c0_i32_2 = arith.constant 0 : i32
    return %c0_i32, %c0_i32_0, %c0_i32_1 : i32, i32, i32
  }
  func.func @transform_2(%arg0: i32) -> (i32, i32) {
    %c0_i32 = arith.constant 0 : i32
    %c0_i32_0 = arith.constant 0 : i32
    %c0_i32_1 = arith.constant 0 : i32
    return %c0_i32, %c0_i32_0 : i32, i32
  }
  func.func @transform_3(%arg0: i32) -> (i32, i32, i32) {
    %c0_i32 = arith.constant 0 : i32
    %c0_i32_0 = arith.constant 0 : i32
    %c0_i32_1 = arith.constant 0 : i32
    return %arg0, %c0_i32, %c0_i32_0 : i32, i32, i32
  }
}

</mosaic_0001>

<bundles_post_ra>
// kernel: den_conv_block.1
= control target key start
LH: loop header
LB: loop body
LE: loop exit
PB: predicated region body
PF: predicated region fallthrough
CT: control target
= control target key end

     0   :  { %s1209_s12 = smov 0   ;;  %s1346_s0 = inlined_call_operand.vmem [shape: f32[2,4,256], index: 0, kind: input, shape index: {}]   ;;  %s1347_s1 = inlined_call_operand.vmem [shape: f32[9,8,8], index: 1, kind: input, shape index: {}]   ;;  %s1348_s2 = inlined_call_operand.vmem [shape: f32[8,1], index: 2, kind: input, shape index: {}]   ;;  %s1349_s3 = inlined_call_operand.vmem [shape: f32[2,8,256], index: 3, kind: output, shape index: {}]  }
   0x1 LB: > { %s1109_s13 = sadd.s32 4294967295, %s1177_s12   ;;  %p1113_p0 = scmp.ge.s32.totalorder %s1177_s12, 1  ;;  %s1177_s12 = sphi %s1209_s12, %s13_s12  }
   0x2   : > { %p137_p1 = scmp.lt.s32.totalorder %s1177_s12, 3 }
   0x4   : > { %p138_p2 = pnand %p1113_p0, %p137_p1 }
   0x5   : > { %s1180_s14 = smov (!%p138_p2), 16   ;;  %s1181_s15 = smov (!%p138_p2), 15  }
   0x6   : > { %141 = sbr.rel (%p138_p2) target bundleno = 383 (0x17f), region = 32  ;;  %p161_p3 = scmp.lt.s32.totalorder (!%p138_p2), %s1109_s13, 1 }
   0x7   : > { %s1182_s16 = smov (!%p138_p2), 17   ;;  %s1183_s21 = smov (!%p138_p2), 1  }
   0x8   : > { %s1184_s22 = smov (!%p138_p2), 127   ;;  %s1185_s23 = smov (!%p138_p2), 113  }
   0x9   : > { %s1186_s24 = smov (!%p138_p2), 112   ;;  %s1188_s25 = smov (!%p138_p2), 111  }
   0xb   : > { %v1179_v0 = vmov 0.0   ;;  %s1351_s13 = smov (!%p161_p3, %s1109_s13), 1  ;;  %v1187_v5 = vmov 0   ;;  %v1042_v6 = vld [vmem:[%s1348_s2] sm:$0xff]  ;;  %v181_v8 = vlaneseq  ;;  %vm256_vm0 = vcmask 130048   ;;  %v1118_v26 = vld [vmem:[%s1347_s1 + $0x8] sm:$0xff] }
   0xc   : > { %250 = vrot.lane.b32.xlu1 %v1179_v0, %s1180_s14  ;;  %173 = vst [vmem:[#allocation2 + $0x10] sm:$0xf0] %v1179_v0  ;;  %174 = vst [vmem:[#allocation2 + $0x18] sm:$0xf0] %v1179_v0  ;;  %414 = vrot.lane.b32.xlu0 %v1179_v0, %s1181_s15  ;;  %s1149_s17 = sshll.u32 %s1351_s13, 3  ;;  %vm420_vm1 = vcmask 121856  }
   0xd   : > { %329 = vmatprep.mubr.f32.mxu0 %v1179_v0  ;;  %403 = vmatprep.mubr.f32.mxu1 %v1179_v0  ;;  %s165_s20 = scalar_lea.vmem %s1346_s0, %s1149_s17  ;;  %v182_v9 = vand.u32 127, %v181_v8  ;;  %vm261_vm3 = vcmask 64512   ;;  %vm240_vm6 = vcmask 138240   ;;  %v247_v33 = vld [vmem:[%s1347_s1] sm:$0xff]  ;;  %v1123_v34 = vld [vmem:[%s1347_s1 + $0x10] sm:$0xff]  ;;  %vm511_vm8 = vcmask 7168  }
   0xe   : > { %v175_v1 = vld [vmem:[%s165_s20] sm:$0xff]  ;;  %1169 = vset.pattern.permute.xlu0 %v1187_v5  ;;  %v1127_v39 = vld [vmem:[%s1347_s1 + $0x18] sm:$0xff]  ;;  %vm686_vm9 = vcmask 1039360   ;;  %v1133_v47 = vld [vmem:[%s1347_s1 + $0x28] sm:$0xff]  ;;  %vm777_vm10 = vcmask 924672   ;;  %vm870_vm11 = vcmask 916480  }
   0xf   : > { %179 = vst [vmem:[#allocation2 + $0x10] sm:$0xf] %v175_v1  ;;  %v177_v2 = vcombine.high %v175_v1, %v175_v1  ;;  %v183_v12 = vadd.s32 128, %v182_v9  ;;  %v188_v16 = vand.u32 15, %v182_v9  ;;  %v1131_v40 = vld [vmem:[%s1347_s1 + $0x20] sm:$0xff]  ;;  %v1137_v52 = vld [vmem:[%s1347_s1 + $0x30] sm:$0xff] }
  0x10   : > { %234 = vrot.lane.b32.xlu1 %v1179_v0, %s1182_s16  ;;  %v1141_v58 = vld [vmem:[%s1347_s1 + $0x38] sm:$0xff]  ;;  %vm957_vm12 = vcmask 908288   ;;  %v1143_v63 = vld [vmem:[%s1347_s1 + $0x40] sm:$0xff] }
  0x11   : > { %180 = vst [vmem:[#allocation2 + $0x18] sm:$0xf] %v177_v2  ;;  %v195_v15 = vand.u32 15, %v183_v12  ;;  %v1260_v20 = vadd.s32 1, %v188_v16  ;;  %v1264_v24 = vadd.s32 4294967295, %v188_v16 }
  0x13   : > { %v1258_v19 = vadd.s32 1, %v195_v15  ;;  %v1262_v21 = vadd.s32 4294967295, %v195_v15  ;;  %vm220_vm4 = vcmp.lt.s32.totalorder %v1260_v20, 16  ;;  %vm210_vm7 = vcmp.ge.s32.totalorder %v1264_v24, 0 }
  0x15   : > { %vm221_vm2 = vcmp.lt.s32.totalorder %v1258_v19, 16  ;;  %vm211_vm5 = vcmp.ge.s32.totalorder %v1262_v21, 0 }
  0x16   : > { %v1230_v3 = vld [vmem:[#allocation2 + $0x10] sm:$0xff] }
  0x17   : > { %252 = vrot.lane.b32.xlu0 %v1230_v3, %s1180_s14  ;;  %236 = vrot.lane.b32.xlu1 %v1230_v3, %s1182_s16 }
  0x18   : > { %v1236_v4 = vld [vmem:[#allocation2 + $0x18] sm:$0xff] }
  0x1b   : > { %416 = vrot.lane.b32.xlu0 %v1230_v3, %s1181_s15  ;;  %507 = vrot.lane.b32.xlu1 %v1230_v3, %s1183_s21 }
  0x1f   : > { %254 = vrot.lane.b32.xlu0 %v1236_v4, %s1180_s14  ;;  %418 = vrot.lane.b32.xlu1 %v1236_v4, %s1181_s15 }
  0x23   : > { %238 = vrot.lane.b32.xlu0 %v1236_v4, %s1182_s16  ;;  %505 = vrot.lane.b32.xlu1 %v1179_v0, %s1183_s21 }
  0x27   : > { %509 = vrot.lane.b32.xlu0 %v1236_v4, %s1183_s21  ;;  %684 = vrot.lane.b32.xlu1 %v1179_v0, %s1184_s22  ;;  %s1150_s21 = sshll.u32 %s1351_s13, 4 }
  0x2b   : > { %682 = vrot.lane.b32.xlu0 %v1236_v4, %s1184_s22  ;;  %773 = vrot.lane.b32.xlu1 %v1236_v4, %s1185_s23 }
  0x2f   : > { %680 = vrot.lane.b32.xlu0 %v1230_v3, %s1184_s22  ;;  %771 = vrot.lane.b32.xlu1 %v1230_v3, %s1185_s23 }
  0x33   : > { %775 = vrot.lane.b32.xlu0 %v1179_v0, %s1185_s23  ;;  %868 = vrot.lane.b32.xlu1 %v1179_v0, %s1186_s24 }
  0x37   : > { %866 = vrot.lane.b32.xlu0 %v1236_v4, %s1186_s24  ;;  %953 = vrot.lane.b32.xlu1 %v1236_v4, %s1188_s25 }
  0x3b   : > { %864 = vrot.lane.b32.xlu0 %v1230_v3, %s1186_s24  ;;  %951 = vrot.lane.b32.xlu1 %v1230_v3, %s1188_s25  ;;  %s170_s24 = scalar_lea.vmem %s1349_s3, %s1150_s21 }
  0x3f   : > { %955 = vrot.lane.b32.xlu0 %v1179_v0, %s1188_s25 }
  0x43   : > { %1045 = vperm.xlu0 %1169, %v1042_v6  }
  0x7e   : > { %v251_v7 = vpop.permute.xlu1 %250  ;;  %v415_v10 = vpop.permute.xlu0 %414 }
  0x82   : > { %v235_v11 = vpop.permute.xlu1 %234 }
  0x89   : > { %v253_v13 = vpop.permute.xlu0 %252  ;;  %v237_v14 = vpop.permute.xlu1 %236 }
  0x8a   : > { %v257_v27 = vsel %vm256_vm0, %v251_v7, %v253_v13  ;;  %v241_v35 = vsel %vm240_vm6, %v235_v11, %v237_v14 }
  0x8d   : > { %v417_v17 = vpop.permute.xlu0 %416  ;;  %v508_v18 = vpop.permute.xlu1 %507 }
  0x8e   : > { %v421_v29 = vsel %vm420_vm1, %v415_v10, %v417_v17 }
  0x91   : > { %v255_v22 = vpop.permute.xlu0 %254  ;;  %v419_v23 = vpop.permute.xlu1 %418 }
  0x92   : > { %v258_v25 = vsel %vm256_vm0, %v253_v13, %v255_v22  ;;  %v422_v28 = vsel %vm420_vm1, %v417_v17, %v419_v23 }
  0x93   : > { %295 = vmatprep.subr.mxu0 %v258_v25 }
  0x94   : > { %296 = vmatpush1.msra.mxu0 %v257_v27 }
  0x95   : > { %1124 = vmatprep.subr.msk.mxu0 %vm221_vm2, %v422_v28  ;;  %v239_v30 = vpop.permute.xlu0 %238  ;;  %1119 = vmatmul.mubr.msk.f32.vlgmr.msra.gmra.mxu0 %vm261_vm3, %v1118_v26  ;;  %v506_v31 = vpop.permute.xlu1 %505 }
  0x96   : > { %1125 = vmatpush1.msk.msra.mxu0 %vm220_vm4, %v421_v29  ;;  %v242_v32 = vsel %vm240_vm6, %v237_v14, %v239_v30  ;;  %496 = vmatprep.mubr.f32.mxu0 %v1179_v0  ;;  %v512_v41 = vsel %vm511_vm8, %v506_v31, %v508_v18 }
  0x97   : > { %1120 = vmatprep.subr.msk.mxu1 %vm211_vm5, %v242_v32  ;;  %631 = vmatprep.subr.mxu0 %v1236_v4 }
  0x98   : > { %1121 = vmatpush1.msk.msra.mxu1 %vm210_vm7, %v241_v35 }
  0x99   : > { %v510_v36 = vpop.permute.xlu0 %509  ;;  %v685_v37 = vpop.permute.xlu1 %684  ;;  %1122 = vmatmul.mubr.msk.f32.vlgmr.msra.gmra.mxu1 %vm261_vm3, %v247_v33  ;;  %1126 = vmatmul.mubr.msk.f32.vlgmr.msra.gmra.mxu0 %vm261_vm3, %v1123_v34 }
  0x9a   : > { %v513_v38 = vsel %vm511_vm8, %v508_v18, %v510_v36  ;;  %587 = vmatprep.mubr.f32.mxu1 %v1179_v0  ;;  %632 = vmatpush1.msra.mxu0 %v1230_v3 }
  0x9b   : > { %1128 = vmatprep.subr.msk.mxu1 %vm211_vm5, %v513_v38  ;;  %665 = vmatprep.mubr.f32.mxu0 %v1179_v0 }
  0x9c   : > { %1129 = vmatpush1.msk.msra.mxu1 %vm210_vm7, %v512_v41 }
  0x9d   : > { %v683_v42 = vpop.permute.xlu0 %682  ;;  %v774_v43 = vpop.permute.xlu1 %773  ;;  %1130 = vmatmul.mubr.msk.f32.vlgmr.msra.gmra.mxu1 %vm261_vm3, %v1127_v39  ;;  %1132 = vmatmul.mubr.msk.f32.vlgmr.msra.gmra.mxu0 %vm261_vm3, %v1131_v40 }
  0x9e   : > { %v688_v44 = vsel %vm686_vm9, %v683_v42, %v685_v37  ;;  %762 = vmatprep.mubr.f32.mxu1 %v1179_v0  ;;  %853 = vmatprep.mubr.f32.mxu0 %v1179_v0 }
  0x9f   : > { %1134 = vmatprep.subr.msk.mxu1 %vm221_vm2, %v688_v44 }
  0xa1   : > { %v681_v45 = vpop.permute.xlu0 %680  ;;  %v772_v46 = vpop.permute.xlu1 %771 }
  0xa2   : > { %v687_v48 = vsel %vm686_vm9, %v681_v45, %v683_v42  ;;  %v778_v53 = vsel %vm777_vm10, %v772_v46, %v774_v43 }
  0xa3   : > { %1135 = vmatpush1.msk.msra.mxu1 %vm220_vm4, %v687_v48 }
  0xa4   : > { %1136 = vmatmul.mubr.msk.f32.vlgmr.msra.gmra.mxu1 %vm261_vm3, %v1133_v47 }
  0xa5   : > { %v776_v49 = vpop.permute.xlu0 %775  ;;  %v869_v50 = vpop.permute.xlu1 %868  ;;  %942 = vmatprep.mubr.f32.mxu1 %v1179_v0 }
  0xa6   : > { %v779_v51 = vsel %vm777_vm10, %v774_v43, %v776_v49 }
  0xa7   : > { %1138 = vmatprep.subr.msk.mxu0 %vm211_vm5, %v779_v51 }
  0xa8   : > { %1139 = vmatpush1.msk.msra.mxu0 %vm210_vm7, %v778_v53 }
  0xa9   : > { %v867_v54 = vpop.permute.xlu0 %866  ;;  %1140 = vmatmul.mubr.msk.f32.vlgmr.msra.gmra.mxu0 %vm261_vm3, %v1137_v52  ;;  %v954_v55 = vpop.permute.xlu1 %953 }
  0xaa   : > { %v872_v56 = vsel %vm870_vm11, %v867_v54, %v869_v50  ;;  %1033 = vmatprep.mubr.f32.mxu0 %v1179_v0 }
  0xab   : > { %908 = vmatprep.subr.mxu1 %v872_v56 }
  0xad   : > { %v865_v57 = vpop.permute.xlu0 %864  ;;  %v952_v60 = vpop.permute.xlu1 %951 }
  0xae   : > { %v871_v59 = vsel %vm870_vm11, %v865_v57, %v867_v54  ;;  %v958_v1 = vsel %vm957_vm12, %v952_v60, %v954_v55 }
  0xaf   : > { %909 = vmatpush1.msra.mxu1 %v871_v59 }
  0xb0   : > { %1142 = vmatmul.mubr.msk.f32.vlgmr.msra.gmra.mxu1 %vm261_vm3, %v1141_v58 }
  0xb1   : > { %v956_v61 = vpop.permute.xlu0 %955 }
  0xb2   : > { %v959_v62 = vsel %vm957_vm12, %v954_v55, %v956_v61 }
  0xb3   : > { %1144 = vmatprep.subr.msk.mxu0 %vm221_vm2, %v959_v62 }
  0xb4   : > { %1145 = vmatpush1.msk.msra.mxu0 %vm220_vm4, %v958_v1 }
  0xb5   : > { %1146 = vmatmul.mubr.msk.f32.vlgmr.msra.gmra.mxu0 %vm261_vm3, %v1143_v63 }
  0xbe   : > { %v1046_v31 = vpop.permute.xlu0 %1045 }
 0x155   : > { %v331_v0 = vpop.f32.mrf.mxu0 }
 0x157   : > { %v333_v2 = vpop.f32.mrf.mxu0 }
 0x159   : > { %v405_v3 = vpop.f32.mrf.mxu1  ;;  %v498_v5 = vpop.f32.mrf.mxu0 }
 0x15a   : > { %v406_v6 = vadd.f32 %v405_v3, %v331_v0 }
 0x15b   : > { %v407_v4 = vpop.f32.mrf.mxu1  ;;  %v500_v8 = vpop.f32.mrf.mxu0 }
 0x15c   : > { %v408_v7 = vadd.f32 %v407_v4, %v333_v2  ;;  %v503_v10 = vadd.f32 %v498_v5, %v406_v6 }
 0x15d   : > { %v589_v9 = vpop.f32.mrf.mxu1  ;;  %v667_v13 = vpop.f32.mrf.mxu0 }
 0x15e   : > { %v504_v11 = vadd.f32 %v500_v8, %v408_v7  ;;  %v594_v14 = vadd.f32 %v589_v9, %v503_v10 }
 0x15f   : > { %v591_v12 = vpop.f32.mrf.mxu1  ;;  %v669_v16 = vpop.f32.mrf.mxu0 }
 0x160   : > { %v595_v15 = vadd.f32 %v591_v12, %v504_v11  ;;  %v672_v18 = vadd.f32 %v667_v13, %v594_v14 }
 0x162   : > { %v673_v19 = vadd.f32 %v669_v16, %v595_v15 }
 0x164   : > { %v764_v17 = vpop.f32.mrf.mxu1 }
 0x165   : > { %v769_v22 = vadd.f32 %v764_v17, %v672_v18 }
 0x166   : > { %v766_v20 = vpop.f32.mrf.mxu1 }
 0x167   : > { %v770_v23 = vadd.f32 %v766_v20, %v673_v19 }
 0x169   : > { %v855_v21 = vpop.f32.mrf.mxu0 }
 0x16a   : > { %v860_v25 = vadd.f32 %v855_v21, %v769_v22 }
 0x16b   : > { %v857_v24 = vpop.f32.mrf.mxu0 }
 0x16c   : > { %v861_v27 = vadd.f32 %v857_v24, %v770_v23 }
 0x170   : > { %v944_v26 = vpop.f32.mrf.mxu1 }
 0x171   : > { %v949_v29 = vadd.f32 %v944_v26, %v860_v25 }
 0x172   : > { %v946_v28 = vpop.f32.mrf.mxu1 }
 0x173   : > { %v950_v32 = vadd.f32 %v946_v28, %v861_v27 }
 0x175   : > { %v1035_v30 = vpop.f32.mrf.mxu0 }
 0x176   : > { %v1040_v33 = vadd.f32 %v1035_v30, %v949_v29 }
 0x177   : > { %v1037_v34 = vpop.f32.mrf.mxu0 }
 0x178   : > { %v1041_v35 = vadd.f32 %v1037_v34, %v950_v32  ;;  %v1048_v36 = vadd.f32 %v1046_v31, %v1040_v33 }
 0x17a   : > { %v1049_v37 = vadd.f32 %v1046_v31, %v1041_v35  ;;  %v1050_v38 = vmax.f32 %v1048_v36, 0.0 }
 0x17c   : > { %v1051_v39 = vmax.f32 %v1049_v37, 0.0  ;;  %1052 = vst [vmem:[%s170_s24] sm:$0xff] %v1050_v38 }
 0x17e   : > { %1053 = vst [vmem:[%s170_s24 + $0x8] sm:$0xff] %v1051_v39 }
 0x17f PF: > { %s13_s12 = sadd.s32 1, %s1177_s12  }
 0x180   : > { %p10_p4 = scmp.ge.s32.totalorder %s13_s12, 4  }
 0x182   :  { %12 = sbr.rel (!%p10_p4) target bundleno = 1 (0x1), region = 70 }

</bundles_post_ra>
